<compile_context>
chip_gen: v6e
topology: v6e:2x2x1
jax: 0.10.0
libtpu: 0.0.40
codegen_flags: <defaults>
</compile_context>

<pallas_src>
import math

import jax
import jax.numpy as jnp
import numpy as np
from jax.experimental import pallas as pl
from jax.experimental.pallas import tpu as pltpu

_LANES = 128
_SUBLANES = 8
_MAX_BLOCK_ROWS = 2048           # (2048, 128) f32 = 1 MiB per buffer


def _round_up(x: int, m: int) -> int:
    return ((x + m - 1) // m) * m


def _contrast_relu_kernel(params_ref, x_ref, o_ref):
    # params_ref: (2,) f32 in SMEM -> [w, b];  x_ref/o_ref: (block_rows, 128)
    w = params_ref[0]
    b = params_ref[1]
    # scalar-ALU hoists (once per grid step, off the vector path)
    w16 = w * jnp.float32(0.0625)            # w / 16
    c = jnp.float32(0.8) + b                 # 0.8 + b

    x = x_ref[...].astype(jnp.float32)
    # sigmoid(x) - 0.5 == 0.5 * tanh(x / 2);  (|.|)**4 is even -> drop abs,
    # fold the (0.5)**4 = 1/16 into w.
    t = jnp.tanh(x * jnp.float32(0.5))       # EUP
    t2 = t * t
    t4 = t2 * t2                             # tanh(x/2) ** 4
    act = c - w16 * t4
    o_ref[...] = jnp.maximum(act, b)         # max(act_weight, zeros_var)


def contrast_relu_forward(dom_res, w: float, b: float):
    """Apply the Contrast-ReLU activation elementwise with a Pallas kernel."""
    orig_shape = dom_res.shape
    squeezed_shape = tuple(s for s in orig_shape if s != 1)   # torch .squeeze()
    n = math.prod(orig_shape)

    # ---- sublane-dense (M, 128) layout, padded to full (block_rows, 128) tiles
    rows = max(1, pl.cdiv(n, _LANES))
    block_rows = min(_round_up(rows, _SUBLANES), _MAX_BLOCK_ROWS)
    rows_padded = _round_up(rows, block_rows)
    total_padded = rows_padded * _LANES
    grid = rows_padded // block_rows

    x_flat = dom_res.reshape(-1)
    if total_padded != n:
        x_flat = jnp.pad(x_flat, (0, total_padded - n))
    x_2d = x_flat.reshape(rows_padded, _LANES)

    params = jnp.array([w, b], dtype=jnp.float32)

    out = pl.pallas_call(
        _contrast_relu_kernel,
        out_shape=jax.ShapeDtypeStruct((rows_padded, _LANES), jnp.float32),
        grid=(grid,),
        in_specs=[
            pl.BlockSpec(memory_space=pltpu.SMEM),                 # [w, b] scalars
            pl.BlockSpec((block_rows, _LANES), lambda i: (i, 0)),  # input tile
        ],
        out_specs=pl.BlockSpec((block_rows, _LANES), lambda i: (i, 0)),
        compiler_params=pltpu.CompilerParams(
            dimension_semantics=("parallel",),
            vmem_limit_bytes=32 * 1024 * 1024,
        ),
    )(params, x_2d)

    final = out.reshape(-1)[:n].reshape(squeezed_shape if squeezed_shape else ())
    return final


class ContrastReLUActivate:
    """JAX/Pallas port of Contrast_ReLU_activate (forward pass)."""

    def __init__(self, init_weight_scale: float, init_bias: float):
        # nn.Parameter(torch.ones(1)) — tiny scalar parameters kept on host so
        # returning float(w)/float(b) never forces a device->host sync.
        # TODO(synk): autodiff through dom_func_weight would require keeping it
        # as a traced JAX value instead of a host scalar.
        self.dom_func_weight = np.ones((1,), dtype=np.float32)
        self.dom_func_bias = np.zeros((1,), dtype=np.float32)    # FloatTensor([0])
        self.weight_scale = float(init_weight_scale)
        self.add_bias = float(init_bias)

    def __call__(self, dom_res, dom_label=None):
        w = float(self.dom_func_weight[0]) * self.weight_scale
        b = float(self.dom_func_bias[0]) + self.add_bias
        final_weight = contrast_relu_forward(dom_res, w, b)
        return final_weight, w, b


if __name__ == "__main__":
    key = jax.random.PRNGKey(0)
    N = 128                                   # batch of discriminator logits
    dom_res = jax.random.normal(key, (N, 1), dtype=jnp.float32)
    dom_label = jnp.concatenate(
        [jnp.ones((N // 2, 1)), jnp.zeros((N // 2, 1))], axis=0
    )  # unused by forward (matches PyTorch)

    module = ContrastReLUActivate(init_weight_scale=2.0, init_bias=0.1)
    final_weight, w_val, b_val = module(dom_res, dom_label)
    final_weight = jax.block_until_ready(final_weight)

    # reference check in plain JAX
    prob = jax.nn.sigmoid(dom_res.astype(jnp.float32)).squeeze()
    var = jnp.abs(prob - 0.5)
    ref = jnp.maximum(0.8 - w_val * var ** 4 + b_val, b_val)
    assert final_weight.shape == (N,), final_weight.shape
    assert jnp.allclose(final_weight, ref, atol=1e-6), "mismatch vs reference"

    print("KERNEL_OK")
</pallas_src>

<mosaic_0001>
module attributes {stable_mosaic.version = 11 : i64} {
  func.func @_contrast_relu_kernel(%arg0: i32, %arg1: memref<2xf32, #tpu.memory_space<smem>>, %arg2: memref<8x128xf32, #tpu.memory_space<vmem>>, %arg3: memref<8x128xf32, #tpu.memory_space<vmem>>) attributes {dimension_semantics = [#tpu.dimension_semantics<parallel>], iteration_bounds = array<i64: 1>, scalar_prefetch = 0 : i64, scratch_operands = 0 : i64, tpu.core_type = #tpu.core_type<tc>, window_params = [{transform_indices = @transform_0, window_bounds = array<i64: 2>}, {transform_indices = @transform_1, window_bounds = array<i64: 8, 128>}, {transform_indices = @transform_2, window_bounds = array<i64: 8, 128>}]} {
    %c0 = arith.constant 0 : index
    %0 = memref.load %arg1[%c0] : memref<2xf32, #tpu.memory_space<smem>>
    %c1 = arith.constant 1 : index
    %1 = memref.load %arg1[%c1] : memref<2xf32, #tpu.memory_space<smem>>
    %cst = arith.constant 6.250000e-02 : f32
    %2 = arith.mulf %0, %cst : f32
    %cst_0 = arith.constant 8.000000e-01 : f32
    %3 = arith.addf %cst_0, %1 : f32
    %c0_1 = arith.constant 0 : index
    %c0_2 = arith.constant 0 : index
    %4 = vector.load %arg2[%c0_1, %c0_2] : memref<8x128xf32, #tpu.memory_space<vmem>>, vector<8x128xf32>
    %cst_3 = arith.constant 5.000000e-01 : f32
    %5 = vector.broadcast %cst_3 : f32 to vector<8x128xf32>
    %6 = arith.mulf %4, %5 : vector<8x128xf32>
    %7 = math.tanh %6 : vector<8x128xf32>
    %8 = arith.mulf %7, %7 : vector<8x128xf32>
    %9 = arith.mulf %8, %8 : vector<8x128xf32>
    %10 = vector.broadcast %2 : f32 to vector<8x128xf32>
    %11 = arith.mulf %10, %9 : vector<8x128xf32>
    %12 = vector.broadcast %3 : f32 to vector<8x128xf32>
    %13 = arith.subf %12, %11 : vector<8x128xf32>
    %14 = vector.broadcast %1 : f32 to vector<8x128xf32>
    %15 = arith.maximumf %13, %14 : vector<8x128xf32>
    %c0_4 = arith.constant 0 : index
    %c0_5 = arith.constant 0 : index
    %16 = vector.load %arg3[%c0_4, %c0_5] : memref<8x128xf32, #tpu.memory_space<vmem>>, vector<8x128xf32>
    tpu.vector_store %arg3[%c0_4, %c0_5], %15 {strides = array<i32>} : memref<8x128xf32, #tpu.memory_space<vmem>>, vector<8x128xf32>,
    return
  }
  func.func @transform_0(%arg0: i32) -> i32 {
    %c0_i32 = arith.constant 0 : i32
    %c0_i32_0 = arith.constant 0 : i32
    return %c0_i32 : i32
  }
  func.func @transform_1(%arg0: i32) -> (i32, i32) {
    %c0_i32 = arith.constant 0 : i32
    %c0_i32_0 = arith.constant 0 : i32
    return %arg0, %c0_i32 : i32, i32
  }
  func.func @transform_2(%arg0: i32) -> (i32, i32) {
    %c0_i32 = arith.constant 0 : i32
    %c0_i32_0 = arith.constant 0 : i32
    return %arg0, %c0_i32 : i32, i32
  }
}

</mosaic_0001>

<bundles_post_ra>
// kernel: tpu_custom_call.1
= control target key start
LH: loop header
LB: loop body
LE: loop exit
PB: predicated region body
PF: predicated region fallthrough
CT: control target
= control target key end

     0   :  { %7 = vsyncpa [#allocation5], 0  ;;  %s154_s0 = inlined_call_operand.hbm [shape: f32[2], index: 0, kind: input, shape index: {}]   ;;  %s155_s1 = inlined_call_operand.hbm [shape: f32[8,128], index: 1, kind: input, shape index: {}]   ;;  %s156_s2 = inlined_call_operand.hbm [shape: f32[8,128], index: 2, kind: output, shape index: {}]  }
   0x1   :  { %8 = vsyncpa [#allocation3], 0 }
   0x2   :  { %9 = vsyncpa [#allocation4], 0  ;;  %s127_s9 = smov [#allocation2]   ;;  %s128_s12 = smov [#allocation6]  }
   0x3   :  { %17 = dma.hbm_to_smem %s154_s0, 16, %s127_s9, [#allocation5]  }
   0x4   :  { %s24_s13 = sshll.u32 %s128_s12, 4  ;;  %s25_s13 = int_to_ptr.vmem [resolvable:$true] %s24_s13 }
   0x5   :  { %s89_s14 = scalar_lea.vmem %s25_s13, 128  ;;  %p94_p1 = scmp.lt.s32.totalorder %s25_s13, %s25_s13 }
   0x6   :  { %p90_p0 = scmp.ne.s32.totalorder %s25_s13, %s89_s14  ;;  %p95_p2 = scmp.lt.s32.totalorder %s89_s14, %s89_s14 }
   0x8   :  { %p96_p3 = por %p95_p2, %p94_p1 }
   0xa   :  { %p97_p4 = pnand %p96_p3, %p90_p0 }
   0xc   :  { %100 = shalt.err (!%p97_p4)
}
   0xd   :  { %27 = dma.hbm_to_vmem [thread:$0]  %s155_s1, 128, %s25_s13, [#allocation3]  }
   0xe   :  { %121 = dma.done.wait [#allocation5], 16  }
   0xf   :  { %122 = vsyncadd [#allocation5], 4294967280 }
  0x10   :  { %123 = dma.done.wait [#allocation3], 128  }
  0x11   :  { %124 = vsyncadd [#allocation3], 4294967168 }
  0x12   :  { %34 = sfence }
  0x13   :  { %v39_v0 = vld [vmem:[#allocation6] sm:$0xff]  ;;  %s35_s0 = sld [smem:[#allocation2]]  ;;  %s129_s1 = smov [#allocation7]  }
  0x14   :  { %v40_v1 = vmul.f32 0.5, %v39_v0  ;;  %s67_s17 = sld [smem:[#allocation2 + $0x1]]  ;;  %s57_s20 = sshll.u32 %s129_s1, 4  ;;  %s58_s20 = int_to_ptr.vmem [resolvable:$true] %s57_s20 }
  0x15   :  { %s101_s21 = scalar_lea.vmem %s58_s20, 128  ;;  %p106_p6 = scmp.lt.s32.totalorder %s58_s20, %s58_s20 }
  0x16   :  { %71 = vtanh.f32 %v40_v1  ;;  %p102_p5 = scmp.ne.s32.totalorder %s58_s20, %s101_s21  ;;  %p107_p7 = scmp.lt.s32.totalorder %s101_s21, %s101_s21 }
  0x18   :  { %p108_p8 = por %p107_p7, %p106_p6 }
  0x19   :  { %s37_s18 = smul.f32 0.0625, %s35_s0 }
  0x1a   :  { %s38_s19 = sadd.f32 0.8, %s67_s17  ;;  %v48_v8 = vstv %s67_s17  ;;  %p109_p9 = pnand %p108_p8, %p102_p5 }
  0x1b   :  { %v44_v4 = vstv %s37_s18 }
  0x1c   :  { %v46_v6 = vstv %s38_s19 }
  0x23   :  { %v72_v2 = vpop.eup %71 }
  0x24   :  { %v42_v3 = vmul.f32 %v72_v2, %v72_v2 }
  0x26   :  { %v43_v5 = vmul.f32 %v42_v3, %v42_v3 }
  0x28   :  { %v45_v7 = vmul.f32 %v44_v4, %v43_v5 }
  0x2a   :  { %v47_v9 = vsub.f32 %v46_v6, %v45_v7 }
  0x2c   :  { %v49_v10 = vmax.f32 %v47_v9, %v48_v8 }
  0x2e   :  { %50 = vst [vmem:[#allocation7] sm:$0xff] %v49_v10 }
  0x2f   :  { %112 = shalt.err (!%p109_p9)
}
  0x30   :  { %60 = dma.vmem_to_hbm [thread:$0]  %s58_s20, 128, %s156_s2, [#allocation4]  }
  0x31   :  { %125 = dma.done.wait [#allocation4], 128  }
  0x32   :  { %126 = vsyncadd [#allocation4], 4294967168 }
  0x33   :  { %64 = vsyncpa [#allocation3], 1 }
  0x34   :  { %65 = vsyncpa [#allocation4], 1 }
  0x35   :  { %66 = vsyncpa [#allocation5], 1 }

</bundles_post_ra>
